<compile_context>
chip_gen: v6e
topology: v6e:2x2x1
jax: 0.10.0
libtpu: 0.0.40
codegen_flags: <defaults>
</compile_context>

<pallas_src>
import functools

import jax
import jax.numpy as jnp
from jax import lax
from jax.experimental import pallas as pl
from jax.experimental.pallas import tpu as pltpu


def _round_up(x, m):
    return (x + m - 1) // m * m


# ----------------------------- Pallas kernels ------------------------------

def _matmul_bias_kernel(a_ref, b_ref, bi_ref, o_ref, *, relu):
    # out = maybe_relu((A @ B) + bias)      bias broadcasts over rows.
    acc = jnp.dot(a_ref[...], b_ref[...], preferred_element_type=jnp.float32)
    out = acc + bi_ref[...]
    if relu:
        out = jnp.maximum(out, 0.0)
    o_ref[...] = out.astype(o_ref.dtype)


def _matmul_bias_res_kernel(a_ref, b_ref, bi_ref, r_ref, o_ref, *, relu):
    # out = maybe_relu((A @ B) + bias + residual)   (fused bottleneck epilogue)
    acc = jnp.dot(a_ref[...], b_ref[...], preferred_element_type=jnp.float32)
    out = acc + bi_ref[...] + r_ref[...].astype(jnp.float32)
    if relu:
        out = jnp.maximum(out, 0.0)
    o_ref[...] = out.astype(o_ref.dtype)


def matmul_bias(a, b, bias, relu=False, residual=None, out_dtype=jnp.bfloat16):
    """Fused (A @ B) + bias (+ residual) (+ ReLU) Pallas matmul.

    a:(M,K) bf16 activations, b:(K,N) bf16 pre-padded weights (BN scale folded
    in), bias:(1,N) f32. Accumulation and epilogue in f32, output in out_dtype.
    """
    M, K = a.shape
    K2, N = b.shape
    assert K == K2, (K, K2)
    assert bias.shape == (1, N)

    # ---- tile selection (256-wide output tiles target the v6e/v7x MXU;
    #      128/round-up(8) keeps small layers padding-free; full-K blocks) ----
    if M >= 256:
        TM = 256
    elif M >= 128:
        TM = 128
    else:
        TM = _round_up(M, 8)
    Mp = _round_up(M, TM)

    if N % 256 == 0:
        TN = 256
    elif N % 128 == 0:
        TN = 128
    else:
        TN = N  # full-dim block (small N like 64; still legal & correct)

    if Mp != M:  # only tiny tail tiles (e.g. batch*1*1 rows) ever hit this.
        a = jnp.pad(a, ((0, Mp - M), (0, 0)))
        if residual is not None:
            residual = jnp.pad(residual, ((0, Mp - M), (0, 0)))

    elem = 2  # bf16 bytes
    bytes_accessed = Mp * K * elem + K * N * elem + N * 4 + Mp * N * elem
    if residual is not None:
        bytes_accessed += Mp * N * elem
    cost = pl.CostEstimate(flops=2 * Mp * N * K, transcendentals=0,
                           bytes_accessed=bytes_accessed)

    in_specs = [
        pl.BlockSpec((TM, K), lambda i, j: (i, 0)),
        pl.BlockSpec((K, TN), lambda i, j: (0, j)),
        pl.BlockSpec((1, TN), lambda i, j: (0, j)),
    ]
    args = [a, b, bias]
    if residual is not None:
        in_specs.append(pl.BlockSpec((TM, TN), lambda i, j: (i, j)))
        args.append(residual)
        kernel = functools.partial(_matmul_bias_res_kernel, relu=relu)
    else:
        kernel = functools.partial(_matmul_bias_kernel, relu=relu)

    out = pl.pallas_call(
        kernel,
        out_shape=jax.ShapeDtypeStruct((Mp, N), out_dtype),
        grid=(Mp // TM, N // TN),
        in_specs=in_specs,
        out_specs=pl.BlockSpec((TM, TN), lambda i, j: (i, j)),
        compiler_params=pltpu.CompilerParams(
            dimension_semantics=("parallel", "parallel"),
            vmem_limit_bytes=32 * 1024 * 1024),
        cost_estimate=cost,
    )(*args)
    if Mp != M:
        out = out[:M]
    return out


# ------------------------------ conv via matmul -----------------------------

def _im2col(x, kh, kw, stride, padding):
    # TODO(synk): 3x3 convs could avoid the 9x im2col blow-up with a K-grid
    # axis over kernel positions + f32 accumulator scratch reading shifted
    # NHWC tiles; kept as bf16 im2col here (1x1 convs bypass it entirely).
    n, h, w, c = x.shape
    xp = jnp.pad(x, ((0, 0), (padding, padding), (padding, padding), (0, 0)))
    ho = (h + 2 * padding - kh) // stride + 1
    wo = (w + 2 * padding - kw) // stride + 1
    patches = []
    for i in range(kh):
        for j in range(kw):
            patches.append(
                xp[:, i:i + stride * ho:stride, j:j + stride * wo:stride, :])
    cols = jnp.stack(patches, axis=3)           # (n, ho, wo, kh*kw, c)
    return cols.reshape(n * ho * wo, kh * kw * c), (n, ho, wo)


def conv_bn(x, p, relu=False, residual=None):
    """Conv + folded eval-BN (+ residual add) (+ ReLU) via the fused matmul."""
    kh, kw, stride, pad = p["kh"], p["kw"], p["stride"], p["pad"]
    if kh == 1 and kw == 1 and pad == 0:
        # 1x1 conv: no im2col, just (strided) reshape to (M, Cin).
        if stride > 1:
            x = x[:, ::stride, ::stride, :]
        n, ho, wo, c = x.shape
        a = x.reshape(n * ho * wo, c)
    else:
        a, (n, ho, wo) = _im2col(x, kh, kw, stride, pad)

    K = a.shape[1]
    Kp = p["w2d"].shape[0]
    if Kp != K:  # only the 7x7 stem conv (K=147 -> 160) hits this.
        a = jnp.pad(a, ((0, 0), (0, Kp - K)))

    res2d = None
    if residual is not None:
        res2d = residual.reshape(n * ho * wo, -1)

    y = matmul_bias(a, p["w2d"], p["bias2d"], relu=relu, residual=res2d,
                    out_dtype=jnp.bfloat16)
    return y.reshape(n, ho, wo, -1)


# ------------------------------ parameters ---------------------------------

class KeyGen:
    def __init__(self, seed):
        self.key = jax.random.PRNGKey(seed)

    def __call__(self):
        self.key, sub = jax.random.split(self.key)
        return sub


def _conv_bn_params(kg, cin, cout, k, stride, pad):
    # TODO(synk): pretrained torchvision weights cannot be loaded in-script;
    # He-init conv weights + identity eval-mode BatchNorm statistics are used.
    fan_in = cin * k * k
    w = jax.random.normal(kg(), (k, k, cin, cout), jnp.float32) * jnp.sqrt(2.0 / fan_in)
    # Eval-mode BN (gamma=1, beta=0, mean=0, var=1, eps=1e-5) folded:
    #   scale = gamma / sqrt(var + eps), bias = beta - mean * scale.
    eps = 1e-5
    scale = jnp.ones((cout,), jnp.float32) / jnp.sqrt(1.0 + eps)
    bias = jnp.zeros((cout,), jnp.float32)
    # Pre-reshape / pre-pad / pre-fold once at build time (no per-call pads).
    K = k * k * cin
    Kp = _round_up(K, 16)
    w2d = w.reshape(K, cout) * scale[None, :]
    w2d = jnp.pad(w2d, ((0, Kp - K), (0, 0))).astype(jnp.bfloat16)
    return {"w2d": w2d, "bias2d": bias.reshape(1, cout),
            "kh": k, "kw": k, "stride": stride, "pad": pad}


def _bottleneck_params(kg, cin, planes, stride):
    p = {
        "conv1": _conv_bn_params(kg, cin, planes, 1, 1, 0),
        "conv2": _conv_bn_params(kg, planes, planes, 3, stride, 1),
        "conv3": _conv_bn_params(kg, planes, planes * 4, 1, 1, 0),
        "downsample": None,
    }
    if stride != 1 or cin != planes * 4:
        p["downsample"] = _conv_bn_params(kg, cin, planes * 4, 1, stride, 0)
    return p


def make_resnet50_params(seed=0):
    kg = KeyGen(seed)
    params = {"conv1": _conv_bn_params(kg, 3, 64, 7, 2, 3)}
    layers = []
    cin = 64
    for planes, blocks, stride in ((64, 3, 1), (128, 4, 2), (256, 6, 2), (512, 3, 2)):
        layer = []
        for b in range(blocks):
            s = stride if b == 0 else 1
            layer.append(_bottleneck_params(kg, cin, planes, s))
            cin = planes * 4
        layers.append(layer)
    params["layers"] = layers
    # FC weight pre-padded 1000 -> 1024 output columns (sliced after matmul).
    fc_w = jax.random.normal(kg(), (2048, 1000), jnp.float32) * jnp.sqrt(1.0 / 2048)
    params["fc_w2d"] = jnp.pad(fc_w, ((0, 0), (0, 24))).astype(jnp.bfloat16)
    params["fc_b2d"] = jnp.zeros((1, 1024), jnp.float32)
    return params


# ------------------------------ forward pass --------------------------------

def bottleneck_forward(x, p):
    identity = x
    out = conv_bn(x, p["conv1"], relu=True)
    out = conv_bn(out, p["conv2"], relu=True)
    if p["downsample"] is not None:
        identity = conv_bn(x, p["downsample"], relu=False)
    # Residual add + ReLU fused into the conv3 matmul epilogue.
    return conv_bn(out, p["conv3"], relu=True, residual=identity)


def resnet50_forward(params, x_nchw):
    # NCHW (PyTorch) -> NHWC (kernel layout), bf16 activations throughout.
    x = jnp.transpose(x_nchw, (0, 2, 3, 1)).astype(jnp.bfloat16)
    x = conv_bn(x, params["conv1"], relu=True)
    # maxpool 3x3 / stride 2 / pad 1 -- small reduction kept in JAX glue.
    # TODO(synk): maxpool could also be written as a Pallas max-reduce kernel.
    x = lax.reduce_window(x, jnp.array(-jnp.inf, dtype=x.dtype), lax.max,
                          (1, 3, 3, 1), (1, 2, 2, 1),
                          padding=((0, 0), (1, 1), (1, 1), (0, 0)))
    for layer in params["layers"]:
        for block in layer:
            x = bottleneck_forward(x, block)
    # AdaptiveAvgPool2d((1,1)) in f32 -> (N, 2048)
    x = jnp.mean(x.astype(jnp.float32), axis=(1, 2))
    logits = matmul_bias(x.astype(jnp.bfloat16), params["fc_w2d"],
                         params["fc_b2d"], relu=False, out_dtype=jnp.float32)
    return logits[:, :1000]  # (N, 1000)


if __name__ == "__main__":
    params = make_resnet50_params(seed=0)
    # Small input consistent with ResNet-50 downsampling (/32): 2x3x32x32 NCHW.
    x = jax.random.normal(jax.random.PRNGKey(0), (2, 3, 32, 32), jnp.float32)
    out = resnet50_forward(params, x)
    jax.block_until_ready(out)
    assert out.shape == (2, 1000), out.shape
    assert bool(jnp.all(jnp.isfinite(out)))
    print("KERNEL_OK")
</pallas_src>

<mosaic_0001>
module attributes {stable_mosaic.version = 11 : i64} {
  func.func @_matmul_bias_kernel(%arg0: i32, %arg1: i32, %arg2: memref<256x160xbf16, #tpu.memory_space<vmem>>, %arg3: memref<160x64xbf16, #tpu.memory_space<vmem>>, %arg4: memref<1x64xf32, #tpu.memory_space<vmem>>, %arg5: memref<256x64xbf16, #tpu.memory_space<vmem>>) attributes {dimension_semantics = [#tpu.dimension_semantics<parallel>, #tpu.dimension_semantics<parallel>], iteration_bounds = array<i64: 2, 1>, scalar_prefetch = 0 : i64, scratch_operands = 0 : i64, tpu.core_type = #tpu.core_type<tc>, window_params = [{transform_indices = @transform_0, window_bounds = array<i64: 256, 160>}, {transform_indices = @transform_1, window_bounds = array<i64: 160, 64>}, {transform_indices = @transform_2, window_bounds = array<i64: 1, 64>}, {transform_indices = @transform_3, window_bounds = array<i64: 256, 64>}]} {
    %c0 = arith.constant 0 : index
    %c0_0 = arith.constant 0 : index
    %0 = vector.load %arg2[%c0, %c0_0] : memref<256x160xbf16, #tpu.memory_space<vmem>>, vector<256x160xbf16>
    %c0_1 = arith.constant 0 : index
    %c0_2 = arith.constant 0 : index
    %1 = vector.load %arg3[%c0_1, %c0_2] : memref<160x64xbf16, #tpu.memory_space<vmem>>, vector<160x64xbf16>
    %cst = arith.constant dense<0.000000e+00> : vector<256x64xf32>
    %2 = tpu.matmul %0, %1, %cst {dimension_numbers = #tpu.dot_dimension_numbers<[1], [0], [0], [1], [0, 0, 1, 1], [], []>} : vector<256x160xbf16>, vector<160x64xbf16>, vector<256x64xf32> -> vector<256x64xf32>
    %c0_3 = arith.constant 0 : index
    %c0_4 = arith.constant 0 : index
    %3 = vector.load %arg4[%c0_3, %c0_4] : memref<1x64xf32, #tpu.memory_space<vmem>>, vector<1x64xf32>
    %4 = vector.broadcast %3 : vector<1x64xf32> to vector<256x64xf32>
    %5 = arith.addf %2, %4 : vector<256x64xf32>
    %cst_5 = arith.constant 0.000000e+00 : f32
    %6 = vector.broadcast %cst_5 : f32 to vector<256x64xf32>
    %7 = arith.maximumf %5, %6 : vector<256x64xf32>
    %8 = arith.truncf %7 : vector<256x64xf32> to vector<256x64xbf16>
    %c0_6 = arith.constant 0 : index
    %c0_7 = arith.constant 0 : index
    %9 = vector.load %arg5[%c0_6, %c0_7] : memref<256x64xbf16, #tpu.memory_space<vmem>>, vector<256x64xbf16>
    tpu.vector_store %arg5[%c0_6, %c0_7], %8 {strides = array<i32>} : memref<256x64xbf16, #tpu.memory_space<vmem>>, vector<256x64xbf16>,
    return
  }
  func.func @transform_0(%arg0: i32, %arg1: i32) -> (i32, i32) {
    %c0_i32 = arith.constant 0 : i32
    %c0_i32_0 = arith.constant 0 : i32
    return %arg0, %c0_i32 : i32, i32
  }
  func.func @transform_1(%arg0: i32, %arg1: i32) -> (i32, i32) {
    %c0_i32 = arith.constant 0 : i32
    %c0_i32_0 = arith.constant 0 : i32
    return %c0_i32, %arg1 : i32, i32
  }
  func.func @transform_2(%arg0: i32, %arg1: i32) -> (i32, i32) {
    %c0_i32 = arith.constant 0 : i32
    %c0_i32_0 = arith.constant 0 : i32
    return %c0_i32, %arg1 : i32, i32
  }
  func.func @transform_3(%arg0: i32, %arg1: i32) -> (i32, i32) {
    %c0_i32 = arith.constant 0 : i32
    return %arg0, %arg1 : i32, i32
  }
}

</mosaic_0001>

<bundles_post_ra>
// kernel: tpu_custom_call.1
= control target key start
LH: loop header
LB: loop body
LE: loop exit
PB: predicated region body
PF: predicated region fallthrough
CT: control target
= control target key end

     0   :  { %s1283_s12 = smov 0   ;;  %s1285_s13 = smov 0   ;;  %s1503_s0 = inlined_call_operand.vmem [shape: bf16[512,160], index: 0, kind: input, shape index: {}]   ;;  %s1504_s1 = inlined_call_operand.vmem [shape: bf16[160,64], index: 1, kind: input, shape index: {}]   ;;  %s1505_s2 = inlined_call_operand.vmem [shape: f32[1,64], index: 2, kind: input, shape index: {}]   ;;  %s1506_s3 = inlined_call_operand.vmem [shape: bf16[512,64], index: 3, kind: output, shape index: {}]  }
   0x1   :  { %s1287_s14 = smov 0  }
   0x2 LB: > { %s25_s15 = sadd.s32 1, %s1256_s13  ;;  %p1003_p0 = scmp.ge.s32.totalorder %s1260_s14, 1  ;;  %s1260_s14 = sphi %s1287_s14, %s13_s14   ;;  %s1256_s13 = sphi %s1285_s13, %s1508_s13   ;;  %s1252_s12 = sphi %s1283_s12, %s1507_s12  }
   0x3   : > { %p27_p1 = scmp.ge.s32.totalorder %s25_s15, 2  ;;  %p170_p2 = scmp.lt.s32.totalorder %s1260_s14, 3 }
   0x5   : > { %s1510_s15 = smov (%p27_p1, %s25_s15), 0  ;;  %p171_p3 = pnand %p1003_p0, %p170_p2 }
   0x6   : > { %s1004_s18 = sshll.u32 (!%p171_p3), %s1252_s12, 5 }
   0x7   : > { %174 = sbr.rel (%p171_p3) target bundleno = 313 (0x139), region = 32  ;;  %p206_p4 = scmp.lt.s32.totalorder (!%p171_p3), %s1004_s18, 63 }
   0xc   : > { %v1180_v0 = vld [vmem:[%s1504_s1 + $0x38] sm:$0xff]   ;;  %v1262_v1 = vmov 0   ;;  %v1181_v2 = vld [vmem:[%s1504_s1 + $0x30] sm:$0xff]   ;;  %s1512_s18 = smov (!%p206_p4, %s1004_s18), 63  ;;  %v1182_v3 = vld [vmem:[%s1504_s1 + $0x28] sm:$0xff]   ;;  %vm492_vm0 = vcmask 261120  }
   0xd   : > { %541 = vmatprep.subr.bf16.mxu0 %v1262_v1  ;;  %1135 = vmatprep.subr.bf16.mxu1 %v1262_v1  ;;  %s1102_s23 = sshll.u32 %s1512_s18, 3  ;;  %v1183_v4 = vld [vmem:[%s1504_s1 + $0x20] sm:$0xff]   ;;  %v1184_v7 = vld [vmem:[%s1504_s1 + $0x18] sm:$0xff]   ;;  %v1185_v8 = vld [vmem:[%s1504_s1 + $0x10] sm:$0xff]   ;;  %s1008_s20 = sshll.u32 %s1512_s18, 2  ;;  %vm862_vm1 = vcmask 519168  }
   0xe   : > { %542 = vmatpush1.bf16.msra.mxu0 %v1180_v0  ;;  %1145 = vmatpush1.bf16.msra.mxu1 %v1180_v0  ;;  %s1316_s26 = scalar_lea.vmem %s1503_s0, %s1102_s23  ;;  %v1186_v9 = vld [vmem:[%s1504_s1 + $0x8] sm:$0xff]   ;;  %v1187_v10 = vld [vmem:[%s1504_s1] sm:$0xff]   ;;  %s1398_s23 = scalar_lea.vmem %s1506_s3, %s1008_s20 }
   0xf   : > { %543 = vmatprep.subr.bf16.mxu0 %v1262_v1  ;;  %1136 = vmatprep.subr.bf16.mxu1 %v1262_v1  ;;  %v1192_v5 = vld [vmem:[%s1316_s26 + $0x4] ss:$8 sps:$4 sm:$0xff]   ;;  %v1190_v13 = vld [vmem:[%s1316_s26] ss:$8 sps:$4 sm:$0xff]   ;;  %v1196_v15 = vld [vmem:[%s1316_s26 + $0x14] ss:$8 sps:$4 sm:$0xff]  }
  0x10   : > { %v1195_v6 = vld [vmem:[%s1316_s26 + $0x84] ss:$8 sps:$4 sm:$0xff]   ;;  %1052 = vmatprep.mubr.msk.bf16.mxu0 %vm492_vm0, %v1192_v5  ;;  %v1193_v14 = vld [vmem:[%s1316_s26 + $0x80] ss:$8 sps:$4 sm:$0xff]   ;;  %v1198_v16 = vld [vmem:[%s1316_s26 + $0x94] ss:$8 sps:$4 sm:$0xff]  }
  0x11   : > { %1060 = vmatprep.mubr.msk.bf16.mxu1 %vm492_vm0, %v1195_v6  ;;  %v1188_v11 = vld [vmem:[%s1504_s1 + $0x48] sm:$0xff]   ;;  %v1189_v12 = vld [vmem:[%s1504_s1 + $0x40] sm:$0xff]   ;;  %v1200_v17 = vld [vmem:[%s1316_s26 + $0x10] ss:$8 sps:$4 sm:$0xff]  }
  0x12   : > { %544 = vmatpush1.bf16.msra.mxu0 %v1181_v2  ;;  %1146 = vmatpush1.bf16.msra.mxu1 %v1181_v2  ;;  %v1201_v18 = vld [vmem:[%s1316_s26 + $0x90] ss:$8 sps:$4 sm:$0xff]   ;;  %v1202_v19 = vld [vmem:[%s1316_s26 + $0x24] ss:$8 sps:$4 sm:$0xff]   ;;  %v1206_v21 = vld [vmem:[%s1316_s26 + $0x20] ss:$8 sps:$4 sm:$0xff]  }
  0x13   : > { %545 = vmatprep.subr.bf16.mxu0 %v1262_v1  ;;  %1137 = vmatprep.subr.bf16.mxu1 %v1262_v1  ;;  %v1204_v20 = vld [vmem:[%s1316_s26 + $0xa4] ss:$8 sps:$4 sm:$0xff]   ;;  %v1207_v22 = vld [vmem:[%s1316_s26 + $0xa0] ss:$8 sps:$4 sm:$0xff]   ;;  %v1208_v23 = vld [vmem:[%s1316_s26 + $0x34] ss:$8 sps:$4 sm:$0xff]  }
  0x14   : > { %v1210_v24 = vld [vmem:[%s1316_s26 + $0xb4] ss:$8 sps:$4 sm:$0xff]   ;;  %v1212_v25 = vld [vmem:[%s1316_s26 + $0x30] ss:$8 sps:$4 sm:$0xff]   ;;  %v1214_v27 = vld [vmem:[%s1316_s26 + $0x44] ss:$8 sps:$4 sm:$0xff]  }
  0x15   : > { %v1213_v26 = vld [vmem:[%s1316_s26 + $0xb0] ss:$8 sps:$4 sm:$0xff]   ;;  %v1216_v28 = vld [vmem:[%s1316_s26 + $0xc4] ss:$8 sps:$4 sm:$0xff]   ;;  %v1218_v29 = vld [vmem:[%s1316_s26 + $0x40] ss:$8 sps:$4 sm:$0xff]  }
  0x16   : > { %546 = vmatpush1.bf16.msra.mxu0 %v1182_v3  ;;  %1147 = vmatpush1.bf16.msra.mxu1 %v1182_v3  ;;  %v1219_v30 = vld [vmem:[%s1316_s26 + $0xc0] ss:$8 sps:$4 sm:$0xff]   ;;  %v1220_v31 = vld [vmem:[%s1316_s26 + $0x54] ss:$8 sps:$4 sm:$0xff]   ;;  %v1224_v33 = vld [vmem:[%s1316_s26 + $0x50] ss:$8 sps:$4 sm:$0xff]  }
  0x17   : > { %547 = vmatprep.subr.bf16.mxu0 %v1262_v1  ;;  %1138 = vmatprep.subr.bf16.mxu1 %v1262_v1  ;;  %v1222_v32 = vld [vmem:[%s1316_s26 + $0xd4] ss:$8 sps:$4 sm:$0xff]   ;;  %v1225_v34 = vld [vmem:[%s1316_s26 + $0xd0] ss:$8 sps:$4 sm:$0xff]   ;;  %v1226_v35 = vld [vmem:[%s1316_s26 + $0x64] ss:$8 sps:$4 sm:$0xff]  }
  0x18   : > { %v1228_v36 = vld [vmem:[%s1316_s26 + $0xe4] ss:$8 sps:$4 sm:$0xff]   ;;  %v1230_v37 = vld [vmem:[%s1316_s26 + $0x60] ss:$8 sps:$4 sm:$0xff]   ;;  %v1232_v39 = vld [vmem:[%s1316_s26 + $0x74] ss:$8 sps:$4 sm:$0xff]  }
  0x19   : > { %v1231_v38 = vld [vmem:[%s1316_s26 + $0xe0] ss:$8 sps:$4 sm:$0xff]   ;;  %v1234_v40 = vld [vmem:[%s1316_s26 + $0xf4] ss:$8 sps:$4 sm:$0xff]   ;;  %v1236_v41 = vld [vmem:[%s1316_s26 + $0x70] ss:$8 sps:$4 sm:$0xff]  }
  0x1a   : > { %548 = vmatpush1.bf16.msra.mxu0 %v1183_v4  ;;  %1148 = vmatpush1.bf16.msra.mxu1 %v1183_v4  ;;  %v1237_v42 = vld [vmem:[%s1316_s26 + $0xf0] ss:$8 sps:$4 sm:$0xff]   ;;  %v1390_v43 = vld [vmem:[%s1505_s2] ss:$0 sm:$0xff] }
  0x1b   : > { %549 = vmatprep.subr.bf16.mxu0 %v1262_v1  ;;  %1139 = vmatprep.subr.bf16.mxu1 %v1262_v1 }
  0x1e   : > { %550 = vmatpush1.bf16.msra.mxu0 %v1184_v7  ;;  %1149 = vmatpush1.bf16.msra.mxu1 %v1184_v7 }
  0x1f   : > { %551 = vmatprep.subr.bf16.mxu0 %v1262_v1  ;;  %1140 = vmatprep.subr.bf16.mxu1 %v1262_v1 }
  0x22   : > { %552 = vmatpush1.bf16.msra.mxu0 %v1185_v8  ;;  %1150 = vmatpush1.bf16.msra.mxu1 %v1185_v8 }
  0x23   : > { %553 = vmatprep.subr.bf16.mxu0 %v1262_v1  ;;  %1141 = vmatprep.subr.bf16.mxu1 %v1262_v1 }
  0x26   : > { %554 = vmatpush1.bf16.msra.mxu0 %v1186_v9  ;;  %1151 = vmatpush1.bf16.msra.mxu1 %v1186_v9 }
  0x27   : > { %555 = vmatprep.subr.bf16.mxu0 %v1262_v1  ;;  %1142 = vmatprep.subr.bf16.mxu1 %v1262_v1 }
  0x2a   : > { %556 = vmatpush1.bf16.msra.mxu0 %v1187_v10  ;;  %1152 = vmatpush1.bf16.msra.mxu1 %v1187_v10 }
  0x2b   : > { %569 = vmatprep.subr.bf16.mxu0 %v1262_v1  ;;  %1143 = vmatprep.subr.bf16.mxu1 %v1262_v1 }
  0x2e   : > { %570 = vmatpush2.bf16.msra.mxu0 %v1188_v11  ;;  %1153 = vmatpush2.bf16.msra.mxu1 %v1188_v11 }
  0x2f   : > { %571 = vmatprep.subr.bf16.mxu0 %v1262_v1  ;;  %1144 = vmatprep.subr.bf16.mxu1 %v1262_v1 }
  0x32   : > { %572 = vmatpush2.bf16.msra.mxu0 %v1189_v12  ;;  %1154 = vmatpush2.bf16.msra.mxu1 %v1189_v12 }
  0x35   : > { %574 = vmatmul.mubr.bf16.vlgmr.msra.gmra.mxu0 %v1190_v13  ;;  %638 = vmatmul.mubr.bf16.vlgmr.msra.gmra.mxu1 %v1193_v14 }
  0x36   : > { %1053 = vmatprep.mubr.msk.bf16.mxu0 %vm492_vm0, %v1196_v15  ;;  %1061 = vmatprep.mubr.msk.bf16.mxu1 %vm492_vm0, %v1198_v16 }
  0x3d   : > { %582 = vmatmul.mubr.bf16.gmra.mxu0 %v1200_v17  ;;  %646 = vmatmul.mubr.bf16.gmra.mxu1 %v1201_v18 }
  0x3e   : > { %1054 = vmatprep.mubr.msk.bf16.mxu0 %vm492_vm0, %v1202_v19  ;;  %1062 = vmatprep.mubr.msk.bf16.mxu1 %vm492_vm0, %v1204_v20 }
  0x45   : > { %590 = vmatmul.mubr.bf16.gmra.mxu0 %v1206_v21  ;;  %654 = vmatmul.mubr.bf16.gmra.mxu1 %v1207_v22 }
  0x46   : > { %1055 = vmatprep.mubr.msk.bf16.mxu0 %vm492_vm0, %v1208_v23  ;;  %1063 = vmatprep.mubr.msk.bf16.mxu1 %vm492_vm0, %v1210_v24 }
  0x4d   : > { %598 = vmatmul.mubr.bf16.gmra.mxu0 %v1212_v25  ;;  %662 = vmatmul.mubr.bf16.gmra.mxu1 %v1213_v26 }
  0x4e   : > { %1056 = vmatprep.mubr.msk.bf16.mxu0 %vm492_vm0, %v1214_v27  ;;  %1064 = vmatprep.mubr.msk.bf16.mxu1 %vm492_vm0, %v1216_v28 }
  0x55   : > { %606 = vmatmul.mubr.bf16.gmra.mxu0 %v1218_v29  ;;  %670 = vmatmul.mubr.bf16.gmra.mxu1 %v1219_v30 }
  0x56   : > { %1057 = vmatprep.mubr.msk.bf16.mxu0 %vm492_vm0, %v1220_v31  ;;  %1065 = vmatprep.mubr.msk.bf16.mxu1 %vm492_vm0, %v1222_v32 }
  0x5d   : > { %614 = vmatmul.mubr.bf16.gmra.mxu0 %v1224_v33  ;;  %678 = vmatmul.mubr.bf16.gmra.mxu1 %v1225_v34 }
  0x5e   : > { %1058 = vmatprep.mubr.msk.bf16.mxu0 %vm492_vm0, %v1226_v35  ;;  %1066 = vmatprep.mubr.msk.bf16.mxu1 %vm492_vm0, %v1228_v36 }
  0x65   : > { %622 = vmatmul.mubr.bf16.gmra.mxu0 %v1230_v37  ;;  %686 = vmatmul.mubr.bf16.gmra.mxu1 %v1231_v38 }
  0x66   : > { %1059 = vmatprep.mubr.msk.bf16.mxu0 %vm492_vm0, %v1232_v39  ;;  %1067 = vmatprep.mubr.msk.bf16.mxu1 %vm492_vm0, %v1234_v40 }
  0x6d   : > { %630 = vmatmul.mubr.bf16.gmra.mxu0 %v1236_v41  ;;  %694 = vmatmul.mubr.bf16.gmra.mxu1 %v1237_v42 }
  0xf5   : > { %v575_v44 = vpop.f32.mrf.mxu0  ;;  %v639_v45 = vpop.f32.mrf.mxu1 }
  0xf6   : > { %v576_v46 = vadd.f32 %v1390_v43, %v575_v44  ;;  %v640_v47 = vadd.f32 %v1390_v43, %v639_v45 }
  0xf7   : > { %v577_v48 = vpop.f32.mrf.mxu0  ;;  %v641_v49 = vpop.f32.mrf.mxu1 }
  0xf8   : > { %v702_v50 = vmax.f32 %v576_v46, 0.0  ;;  %v718_v51 = vmax.f32 %v640_v47, 0.0 }
  0xf9   : > { %v578_v52 = vpop.f32.mrf.mxu0  ;;  %v642_v53 = vpop.f32.mrf.mxu1 }
  0xfa   : > { %v1103_v54 = vpack.c.bf16 %v702_v50, %v702_v50  ;;  %v1119_v55 = vpack.c.bf16 %v718_v51, %v718_v51  ;;  %v579_v56 = vadd.f32 %v1390_v43, %v578_v52  ;;  %v643_v57 = vadd.f32 %v1390_v43, %v642_v53 }
  0xfb   : > { %v580_v58 = vpop.f32.mrf.mxu0  ;;  %v644_v59 = vpop.f32.mrf.mxu1 }
  0xfc   : > { %863 = vst.msk [vmem:[%s1398_s23] sm:$0xf] %vm862_vm1, %v1103_v54  ;;  %879 = vst.msk [vmem:[%s1398_s23 + $0x40] sm:$0xf] %vm862_vm1, %v1119_v55  ;;  %v703_v60 = vmax.f32 %v579_v56, 0.0  ;;  %v719_v61 = vmax.f32 %v643_v57, 0.0 }
  0xfd   : > { %v583_v62 = vpop.f32.mrf.mxu0  ;;  %v647_v63 = vpop.f32.mrf.mxu1 }
  0xfe   : > { %v1104_v0 = vpack.c.bf16 %v703_v60, %v703_v60  ;;  %v1120_v1 = vpack.c.bf16 %v719_v61, %v719_v61  ;;  %v584_v2 = vadd.f32 %v1390_v43, %v583_v62  ;;  %v648_v3 = vadd.f32 %v1390_v43, %v647_v63 }
  0xff   : > { %v585_v4 = vpop.f32.mrf.mxu0  ;;  %v649_v5 = vpop.f32.mrf.mxu1 }
 0x100   : > { %864 = vst.msk [vmem:[%s1398_s23 + $0x4] sm:$0xf] %vm862_vm1, %v1104_v0  ;;  %880 = vst.msk [vmem:[%s1398_s23 + $0x44] sm:$0xf] %vm862_vm1, %v1120_v1  ;;  %v704_v6 = vmax.f32 %v584_v2, 0.0  ;;  %v720_v7 = vmax.f32 %v648_v3, 0.0 }
 0x101   : > { %v586_v8 = vpop.f32.mrf.mxu0  ;;  %v650_v9 = vpop.f32.mrf.mxu1 }
 0x102   : > { %v1105_v10 = vpack.c.bf16 %v704_v6, %v704_v6  ;;  %v1121_v11 = vpack.c.bf16 %v720_v7, %v720_v7  ;;  %v587_v12 = vadd.f32 %v1390_v43, %v586_v8  ;;  %v651_v13 = vadd.f32 %v1390_v43, %v650_v9 }
 0x103   : > { %v588_v14 = vpop.f32.mrf.mxu0  ;;  %v652_v15 = vpop.f32.mrf.mxu1 }
 0x104   : > { %865 = vst.msk [vmem:[%s1398_s23 + $0x8] sm:$0xf] %vm862_vm1, %v1105_v10  ;;  %881 = vst.msk [vmem:[%s1398_s23 + $0x48] sm:$0xf] %vm862_vm1, %v1121_v11  ;;  %v705_v16 = vmax.f32 %v587_v12, 0.0  ;;  %v721_v17 = vmax.f32 %v651_v13, 0.0 }
 0x105   : > { %v591_v18 = vpop.f32.mrf.mxu0  ;;  %v655_v19 = vpop.f32.mrf.mxu1 }
 0x106   : > { %v1106_v20 = vpack.c.bf16 %v705_v16, %v705_v16  ;;  %v1122_v21 = vpack.c.bf16 %v721_v17, %v721_v17  ;;  %v592_v22 = vadd.f32 %v1390_v43, %v591_v18  ;;  %v656_v23 = vadd.f32 %v1390_v43, %v655_v19 }
 0x107   : > { %v593_v24 = vpop.f32.mrf.mxu0  ;;  %v657_v25 = vpop.f32.mrf.mxu1 }
 0x108   : > { %866 = vst.msk [vmem:[%s1398_s23 + $0xc] sm:$0xf] %vm862_vm1, %v1106_v20  ;;  %882 = vst.msk [vmem:[%s1398_s23 + $0x4c] sm:$0xf] %vm862_vm1, %v1122_v21  ;;  %v706_v26 = vmax.f32 %v592_v22, 0.0  ;;  %v722_v27 = vmax.f32 %v656_v23, 0.0 }
 0x109   : > { %v594_v28 = vpop.f32.mrf.mxu0  ;;  %v658_v29 = vpop.f32.mrf.mxu1 }
 0x10a   : > { %v1107_v30 = vpack.c.bf16 %v706_v26, %v706_v26  ;;  %v1123_v31 = vpack.c.bf16 %v722_v27, %v722_v27  ;;  %v595_v32 = vadd.f32 %v1390_v43, %v594_v28  ;;  %v659_v33 = vadd.f32 %v1390_v43, %v658_v29 }
 0x10b   : > { %v596_v34 = vpop.f32.mrf.mxu0  ;;  %v660_v35 = vpop.f32.mrf.mxu1 }
 0x10c   : > { %867 = vst.msk [vmem:[%s1398_s23 + $0x10] sm:$0xf] %vm862_vm1, %v1107_v30  ;;  %883 = vst.msk [vmem:[%s1398_s23 + $0x50] sm:$0xf] %vm862_vm1, %v1123_v31  ;;  %v707_v36 = vmax.f32 %v595_v32, 0.0  ;;  %v723_v37 = vmax.f32 %v659_v33, 0.0 }
 0x10d   : > { %v599_v38 = vpop.f32.mrf.mxu0  ;;  %v663_v39 = vpop.f32.mrf.mxu1 }
 0x10e   : > { %v1108_v40 = vpack.c.bf16 %v707_v36, %v707_v36  ;;  %v1124_v41 = vpack.c.bf16 %v723_v37, %v723_v37  ;;  %v600_v42 = vadd.f32 %v1390_v43, %v599_v38  ;;  %v664_v44 = vadd.f32 %v1390_v43, %v663_v39 }
 0x10f   : > { %v601_v45 = vpop.f32.mrf.mxu0  ;;  %v665_v46 = vpop.f32.mrf.mxu1 }
 0x110   : > { %868 = vst.msk [vmem:[%s1398_s23 + $0x14] sm:$0xf] %vm862_vm1, %v1108_v40  ;;  %884 = vst.msk [vmem:[%s1398_s23 + $0x54] sm:$0xf] %vm862_vm1, %v1124_v41  ;;  %v708_v47 = vmax.f32 %v600_v42, 0.0  ;;  %v724_v48 = vmax.f32 %v664_v44, 0.0 }
 0x111   : > { %v602_v49 = vpop.f32.mrf.mxu0  ;;  %v666_v50 = vpop.f32.mrf.mxu1 }
 0x112   : > { %v1109_v51 = vpack.c.bf16 %v708_v47, %v708_v47  ;;  %v1125_v52 = vpack.c.bf16 %v724_v48, %v724_v48  ;;  %v603_v53 = vadd.f32 %v1390_v43, %v602_v49  ;;  %v667_v54 = vadd.f32 %v1390_v43, %v666_v50 }
 0x113   : > { %v604_v55 = vpop.f32.mrf.mxu0  ;;  %v668_v56 = vpop.f32.mrf.mxu1 }
 0x114   : > { %869 = vst.msk [vmem:[%s1398_s23 + $0x18] sm:$0xf] %vm862_vm1, %v1109_v51  ;;  %885 = vst.msk [vmem:[%s1398_s23 + $0x58] sm:$0xf] %vm862_vm1, %v1125_v52  ;;  %v709_v57 = vmax.f32 %v603_v53, 0.0  ;;  %v725_v58 = vmax.f32 %v667_v54, 0.0 }
 0x115   : > { %v607_v59 = vpop.f32.mrf.mxu0  ;;  %v671_v60 = vpop.f32.mrf.mxu1 }
 0x116   : > { %v1110_v61 = vpack.c.bf16 %v709_v57, %v709_v57  ;;  %v1126_v62 = vpack.c.bf16 %v725_v58, %v725_v58  ;;  %v608_v63 = vadd.f32 %v1390_v43, %v607_v59  ;;  %v672_v0 = vadd.f32 %v1390_v43, %v671_v60 }
 0x117   : > { %v609_v1 = vpop.f32.mrf.mxu0  ;;  %v673_v2 = vpop.f32.mrf.mxu1 }
 0x118   : > { %870 = vst.msk [vmem:[%s1398_s23 + $0x1c] sm:$0xf] %vm862_vm1, %v1110_v61  ;;  %886 = vst.msk [vmem:[%s1398_s23 + $0x5c] sm:$0xf] %vm862_vm1, %v1126_v62  ;;  %v710_v3 = vmax.f32 %v608_v63, 0.0  ;;  %v726_v4 = vmax.f32 %v672_v0, 0.0 }
 0x119   : > { %v610_v5 = vpop.f32.mrf.mxu0  ;;  %v674_v6 = vpop.f32.mrf.mxu1 }
 0x11a   : > { %v1111_v7 = vpack.c.bf16 %v710_v3, %v710_v3  ;;  %v1127_v8 = vpack.c.bf16 %v726_v4, %v726_v4  ;;  %v611_v9 = vadd.f32 %v1390_v43, %v610_v5  ;;  %v675_v10 = vadd.f32 %v1390_v43, %v674_v6 }
 0x11b   : > { %v612_v11 = vpop.f32.mrf.mxu0  ;;  %v676_v12 = vpop.f32.mrf.mxu1 }
 0x11c   : > { %871 = vst.msk [vmem:[%s1398_s23 + $0x20] sm:$0xf] %vm862_vm1, %v1111_v7  ;;  %887 = vst.msk [vmem:[%s1398_s23 + $0x60] sm:$0xf] %vm862_vm1, %v1127_v8  ;;  %v711_v13 = vmax.f32 %v611_v9, 0.0  ;;  %v727_v14 = vmax.f32 %v675_v10, 0.0 }
 0x11d   : > { %v615_v15 = vpop.f32.mrf.mxu0  ;;  %v679_v16 = vpop.f32.mrf.mxu1 }
 0x11e   : > { %v1112_v17 = vpack.c.bf16 %v711_v13, %v711_v13  ;;  %v1128_v18 = vpack.c.bf16 %v727_v14, %v727_v14  ;;  %v616_v19 = vadd.f32 %v1390_v43, %v615_v15  ;;  %v680_v20 = vadd.f32 %v1390_v43, %v679_v16 }
 0x11f   : > { %v617_v21 = vpop.f32.mrf.mxu0  ;;  %v681_v22 = vpop.f32.mrf.mxu1 }
 0x120   : > { %872 = vst.msk [vmem:[%s1398_s23 + $0x24] sm:$0xf] %vm862_vm1, %v1112_v17  ;;  %888 = vst.msk [vmem:[%s1398_s23 + $0x64] sm:$0xf] %vm862_vm1, %v1128_v18  ;;  %v712_v23 = vmax.f32 %v616_v19, 0.0  ;;  %v728_v24 = vmax.f32 %v680_v20, 0.0 }
 0x121   : > { %v618_v25 = vpop.f32.mrf.mxu0  ;;  %v682_v26 = vpop.f32.mrf.mxu1 }
 0x122   : > { %v1113_v27 = vpack.c.bf16 %v712_v23, %v712_v23  ;;  %v1129_v28 = vpack.c.bf16 %v728_v24, %v728_v24  ;;  %v619_v29 = vadd.f32 %v1390_v43, %v618_v25  ;;  %v683_v30 = vadd.f32 %v1390_v43, %v682_v26 }
 0x123   : > { %v620_v31 = vpop.f32.mrf.mxu0  ;;  %v684_v32 = vpop.f32.mrf.mxu1 }
 0x124   : > { %873 = vst.msk [vmem:[%s1398_s23 + $0x28] sm:$0xf] %vm862_vm1, %v1113_v27  ;;  %889 = vst.msk [vmem:[%s1398_s23 + $0x68] sm:$0xf] %vm862_vm1, %v1129_v28  ;;  %v713_v33 = vmax.f32 %v619_v29, 0.0  ;;  %v729_v34 = vmax.f32 %v683_v30, 0.0 }
 0x125   : > { %v623_v35 = vpop.f32.mrf.mxu0  ;;  %v687_v36 = vpop.f32.mrf.mxu1 }
 0x126   : > { %v1114_v37 = vpack.c.bf16 %v713_v33, %v713_v33  ;;  %v1130_v38 = vpack.c.bf16 %v729_v34, %v729_v34  ;;  %v624_v39 = vadd.f32 %v1390_v43, %v623_v35  ;;  %v688_v40 = vadd.f32 %v1390_v43, %v687_v36 }
 0x127   : > { %v625_v41 = vpop.f32.mrf.mxu0  ;;  %v689_v42 = vpop.f32.mrf.mxu1 }
 0x128   : > { %874 = vst.msk [vmem:[%s1398_s23 + $0x2c] sm:$0xf] %vm862_vm1, %v1114_v37  ;;  %890 = vst.msk [vmem:[%s1398_s23 + $0x6c] sm:$0xf] %vm862_vm1, %v1130_v38  ;;  %v714_v44 = vmax.f32 %v624_v39, 0.0  ;;  %v730_v45 = vmax.f32 %v688_v40, 0.0 }
 0x129   : > { %v626_v46 = vpop.f32.mrf.mxu0  ;;  %v690_v47 = vpop.f32.mrf.mxu1 }
 0x12a   : > { %v1115_v48 = vpack.c.bf16 %v714_v44, %v714_v44  ;;  %v1131_v49 = vpack.c.bf16 %v730_v45, %v730_v45  ;;  %v627_v50 = vadd.f32 %v1390_v43, %v626_v46  ;;  %v691_v51 = vadd.f32 %v1390_v43, %v690_v47 }
 0x12b   : > { %v628_v52 = vpop.f32.mrf.mxu0  ;;  %v692_v53 = vpop.f32.mrf.mxu1 }
 0x12c   : > { %875 = vst.msk [vmem:[%s1398_s23 + $0x30] sm:$0xf] %vm862_vm1, %v1115_v48  ;;  %891 = vst.msk [vmem:[%s1398_s23 + $0x70] sm:$0xf] %vm862_vm1, %v1131_v49  ;;  %v715_v54 = vmax.f32 %v627_v50, 0.0  ;;  %v731_v55 = vmax.f32 %v691_v51, 0.0 }
 0x12d   : > { %v631_v56 = vpop.f32.mrf.mxu0  ;;  %v695_v57 = vpop.f32.mrf.mxu1 }
 0x12e   : > { %v1116_v58 = vpack.c.bf16 %v715_v54, %v715_v54  ;;  %v1132_v59 = vpack.c.bf16 %v731_v55, %v731_v55  ;;  %v632_v60 = vadd.f32 %v1390_v43, %v631_v56  ;;  %v696_v61 = vadd.f32 %v1390_v43, %v695_v57 }
 0x12f   : > { %v633_v62 = vpop.f32.mrf.mxu0  ;;  %v697_v63 = vpop.f32.mrf.mxu1 }
 0x130   : > { %876 = vst.msk [vmem:[%s1398_s23 + $0x34] sm:$0xf] %vm862_vm1, %v1116_v58  ;;  %892 = vst.msk [vmem:[%s1398_s23 + $0x74] sm:$0xf] %vm862_vm1, %v1132_v59  ;;  %v716_v0 = vmax.f32 %v632_v60, 0.0  ;;  %v732_v1 = vmax.f32 %v696_v61, 0.0 }
 0x131   : > { %v634_v2 = vpop.f32.mrf.mxu0  ;;  %v698_v3 = vpop.f32.mrf.mxu1 }
 0x132   : > { %v1117_v4 = vpack.c.bf16 %v716_v0, %v716_v0  ;;  %v1133_v5 = vpack.c.bf16 %v732_v1, %v732_v1  ;;  %v635_v6 = vadd.f32 %v1390_v43, %v634_v2  ;;  %v699_v7 = vadd.f32 %v1390_v43, %v698_v3 }
 0x133   : > { %v636_v8 = vpop.f32.mrf.mxu0  ;;  %v700_v9 = vpop.f32.mrf.mxu1 }
 0x134   : > { %877 = vst.msk [vmem:[%s1398_s23 + $0x38] sm:$0xf] %vm862_vm1, %v1117_v4  ;;  %893 = vst.msk [vmem:[%s1398_s23 + $0x78] sm:$0xf] %vm862_vm1, %v1133_v5  ;;  %v717_v10 = vmax.f32 %v635_v6, 0.0  ;;  %v733_v11 = vmax.f32 %v699_v7, 0.0 }
 0x136   : > { %v1118_v12 = vpack.c.bf16 %v717_v10, %v717_v10  ;;  %v1134_v13 = vpack.c.bf16 %v733_v11, %v733_v11 }
 0x138   : > { %878 = vst.msk [vmem:[%s1398_s23 + $0x3c] sm:$0xf] %vm862_vm1, %v1118_v12  ;;  %894 = vst.msk [vmem:[%s1398_s23 + $0x7c] sm:$0xf] %vm862_vm1, %v1134_v13 }
 0x139 PF: > { %s13_s14 = sadd.s32 1, %s1260_s14   ;;  %s1507_s12 = smov %s1256_s13 }
 0x13a   : > { %p10_p5 = scmp.ge.s32.totalorder %s13_s14, 4   ;;  %s1508_s13 = smov %s1510_s15 }
 0x13c   :  { %12 = sbr.rel (!%p10_p5) target bundleno = 2 (0x2), region = 68 }

</bundles_post_ra>
